<compile_context>
chip_gen: v7x
topology: tpu7x:2x2x1
jax: 0.10.0
libtpu: 0.0.40
codegen_flags: <defaults>
</compile_context>

<pallas_src>
import jax
import jax.numpy as jnp
from jax.experimental import pallas as pl
from jax.experimental.pallas import tpu as pltpu


def _round_up(v, m):
    return ((v + m - 1) // m) * m


def _avg_pool_kernel(p_ref, x_ref, o_ref, acc_ref):
    # p_ref  : (tile_m, tile_k)  bf16 normalized cluster-assignment tile
    # x_ref  : (tile_k, c_pad)   bf16 node-feature tile (reduction slice)
    # o_ref  : (tile_m, c_pad)   f32 pooled output tile (written on last k step)
    # acc_ref: (tile_m, c_pad)   f32 accumulator scratch
    k = pl.program_id(1)

    @pl.when(k == 0)
    def _():
        acc_ref[...] = jnp.zeros_like(acc_ref)

    acc_ref[...] += jnp.dot(p_ref[...], x_ref[...],
                            preferred_element_type=jnp.float32)

    @pl.when(k == pl.num_programs(1) - 1)
    def _():
        o_ref[...] = acc_ref[...].astype(o_ref.dtype)


def pooling_graph(x, cluster, num_clusters, *, tile_m=256, tile_k=512,
                  compute_dtype=jnp.bfloat16, buffer_count=None):
    """Cluster average pooling: out[c] = mean of x[i] over nodes with cluster[i] == c.

    x            : (N, C) float32 node features
    cluster      : (N,)   int32 consecutive cluster ids in [0, num_clusters)
    num_clusters : static int K
    """
    n, c = x.shape
    k = int(num_clusters)

    # TPU-friendly padded sizes:
    #   output rows (clusters): multiple of tile_m  (sublane dim -> multiple of 8)
    #   reduction dim (nodes) : multiple of tile_k  (lane dim of P -> multiple of 128)
    #   channels              : multiple of 128     (lane-dense, unmasked output stores)
    tile_m = min(tile_m, _round_up(k, 8))
    tile_k = min(tile_k, _round_up(n, 128))
    k_pad = _round_up(k, tile_m)
    n_pad = _round_up(n, tile_k)
    c_pad = _round_up(c, 128)

    # --- glue (plain JAX): dense normalized assignment matrix for mean pooling ---
    cluster = cluster.astype(jnp.int32)
    counts = jnp.zeros((k_pad,), jnp.float32).at[cluster].add(1.0)
    inv = 1.0 / jnp.maximum(counts, 1.0)           # empty clusters keep all-zero rows
    p = jnp.zeros((k_pad, n_pad), compute_dtype).at[cluster, jnp.arange(n)].set(
        inv[cluster].astype(compute_dtype))

    x_pad = jnp.zeros((n_pad, c_pad), compute_dtype).at[:n, :c].set(
        x.astype(compute_dtype))

    grid = (k_pad // tile_m, n_pad // tile_k)

    p_spec_kwargs = {}
    if buffer_count is not None:
        # Deeper buffering on the only large per-step stream, if its DMA is exposed.
        p_spec_kwargs["pipeline_mode"] = pl.Buffered(buffer_count)

    out_pad = pl.pallas_call(
        _avg_pool_kernel,
        out_shape=jax.ShapeDtypeStruct((k_pad, c_pad), x.dtype),
        grid=grid,
        in_specs=[
            pl.BlockSpec((tile_m, tile_k), lambda i, kk: (i, kk), **p_spec_kwargs),
            pl.BlockSpec((tile_k, c_pad), lambda i, kk: (kk, 0)),
        ],
        out_specs=pl.BlockSpec((tile_m, c_pad), lambda i, kk: (i, 0)),
        scratch_shapes=[pltpu.VMEM((tile_m, c_pad), jnp.float32)],
        compiler_params=pltpu.CompilerParams(
            dimension_semantics=("parallel", "arbitrary"),
            vmem_limit_bytes=64 * 1024 * 1024,
        ),
    )(p, x_pad)

    return out_pad[:k, :c]


def _reference(x, cluster, num_clusters):
    sums = jnp.zeros((num_clusters, x.shape[1]), jnp.float32).at[cluster].add(x)
    cnt = jnp.zeros((num_clusters,), jnp.float32).at[cluster].add(1.0)
    return sums / jnp.maximum(cnt, 1.0)[:, None]


if __name__ == "__main__":
    key = jax.random.PRNGKey(0)
    k_x, k_perm = jax.random.split(key, 2)

    N, C, K = 512, 96, 64   # small graph: 512 nodes, 96 channels, 64 clusters

    x = jax.random.normal(k_x, (N, C), dtype=jnp.float32)
    # Already-consecutive cluster ids (what PyG's consecutive_cluster would yield),
    # every cluster non-empty, random membership.
    cluster = jax.random.permutation(k_perm, jnp.arange(N, dtype=jnp.int32) % K)

    out = pooling_graph(x, cluster, K)
    out = jax.block_until_ready(out)

    ref = _reference(x, cluster, K)
    assert out.shape == (K, C)
    err = float(jnp.max(jnp.abs(out - ref)))
    # bf16-streamed operands with f32 accumulation -> loosened tolerance vs. pure f32.
    assert jnp.allclose(out, ref, atol=3e-2, rtol=3e-2), err

    print("KERNEL_OK")
</pallas_src>

<mosaic_0001>
module attributes {stable_mosaic.version = 11 : i64} {
  func.func @_avg_pool_kernel(%arg0: i32, %arg1: i32, %arg2: memref<64x512xbf16, #tpu.memory_space<vmem>>, %arg3: memref<512x128xbf16, #tpu.memory_space<vmem>>, %arg4: memref<64x128xf32, #tpu.memory_space<vmem>>, %arg5: memref<64x128xf32, #tpu.memory_space<vmem>>) attributes {dimension_semantics = [#tpu.dimension_semantics<parallel>, #tpu.dimension_semantics<arbitrary>], iteration_bounds = array<i64: 1, 1>, scalar_prefetch = 0 : i64, scratch_operands = 1 : i64, tpu.core_type = #tpu.core_type<tc>, window_params = [{transform_indices = @transform_0, window_bounds = array<i64: 64, 512>}, {transform_indices = @transform_1, window_bounds = array<i64: 512, 128>}, {transform_indices = @transform_2, window_bounds = array<i64: 64, 128>}]} {
    %c0_i32 = arith.constant 0 : i32
    %0 = arith.cmpi eq, %arg1, %c0_i32 : i32
    %1 = arith.extui %0 : i1 to i32
    %c0_i32_0 = arith.constant 0 : i32
    %2 = arith.cmpi ne, %1, %c0_i32_0 : i32
    scf.if %2 {
      %cst_10 = arith.constant 0.000000e+00 : f32
      %12 = vector.broadcast %cst_10 : f32 to vector<64x128xf32>
      %c0_11 = arith.constant 0 : index
      %c0_12 = arith.constant 0 : index
      %13 = vector.load %arg5[%c0_11, %c0_12] : memref<64x128xf32, #tpu.memory_space<vmem>>, vector<64x128xf32>
      tpu.vector_store %arg5[%c0_11, %c0_12], %12 {strides = array<i32>} : memref<64x128xf32, #tpu.memory_space<vmem>>, vector<64x128xf32>,
    } else {
    }
    %c0 = arith.constant 0 : index
    %c0_1 = arith.constant 0 : index
    %3 = vector.load %arg5[%c0, %c0_1] : memref<64x128xf32, #tpu.memory_space<vmem>>, vector<64x128xf32>
    %c0_2 = arith.constant 0 : index
    %c0_3 = arith.constant 0 : index
    %4 = vector.load %arg2[%c0_2, %c0_3] : memref<64x512xbf16, #tpu.memory_space<vmem>>, vector<64x512xbf16>
    %c0_4 = arith.constant 0 : index
    %c0_5 = arith.constant 0 : index
    %5 = vector.load %arg3[%c0_4, %c0_5] : memref<512x128xbf16, #tpu.memory_space<vmem>>, vector<512x128xbf16>
    %cst = arith.constant dense<0.000000e+00> : vector<64x128xf32>
    %6 = tpu.matmul %4, %5, %cst {dimension_numbers = #tpu.dot_dimension_numbers<[1], [0], [0], [1], [0, 0, 1, 1], [], []>} : vector<64x512xbf16>, vector<512x128xbf16>, vector<64x128xf32> -> vector<64x128xf32>
    %7 = arith.addf %3, %6 : vector<64x128xf32>
    %c0_6 = arith.constant 0 : index
    %c0_7 = arith.constant 0 : index
    %8 = vector.load %arg5[%c0_6, %c0_7] : memref<64x128xf32, #tpu.memory_space<vmem>>, vector<64x128xf32>
    tpu.vector_store %arg5[%c0_6, %c0_7], %7 {strides = array<i32>} : memref<64x128xf32, #tpu.memory_space<vmem>>, vector<64x128xf32>,
    %c0_i32_8 = arith.constant 0 : i32
    %9 = arith.cmpi eq, %arg1, %c0_i32_8 : i32
    %10 = arith.extui %9 : i1 to i32
    %c0_i32_9 = arith.constant 0 : i32
    %11 = arith.cmpi ne, %10, %c0_i32_9 : i32
    scf.if %11 {
      %c0_10 = arith.constant 0 : index
      %c0_11 = arith.constant 0 : index
      %12 = vector.load %arg5[%c0_10, %c0_11] : memref<64x128xf32, #tpu.memory_space<vmem>>, vector<64x128xf32>
      %c0_12 = arith.constant 0 : index
      %c0_13 = arith.constant 0 : index
      %13 = vector.load %arg4[%c0_12, %c0_13] : memref<64x128xf32, #tpu.memory_space<vmem>>, vector<64x128xf32>
      tpu.vector_store %arg4[%c0_12, %c0_13], %12 {strides = array<i32>} : memref<64x128xf32, #tpu.memory_space<vmem>>, vector<64x128xf32>,
    } else {
    }
    return
  }
  func.func @transform_0(%arg0: i32, %arg1: i32) -> (i32, i32) {
    %c0_i32 = arith.constant 0 : i32
    return %arg0, %arg1 : i32, i32
  }
  func.func @transform_1(%arg0: i32, %arg1: i32) -> (i32, i32) {
    %c0_i32 = arith.constant 0 : i32
    %c0_i32_0 = arith.constant 0 : i32
    return %arg1, %c0_i32 : i32, i32
  }
  func.func @transform_2(%arg0: i32, %arg1: i32) -> (i32, i32) {
    %c0_i32 = arith.constant 0 : i32
    %c0_i32_0 = arith.constant 0 : i32
    return %arg0, %c0_i32 : i32, i32
  }
}

</mosaic_0001>

<bundles_post_ra>
// kernel: tpu_custom_call.1
= control target key start
LH: loop header
LB: loop body
LE: loop exit
PB: predicated region body
PF: predicated region fallthrough
CT: control target
= control target key end

     0   :  { %7 = vsyncpa [#allocation4], 0  ;;  %s921_s0 = inlined_call_operand.hbm [shape: bf16[64,512], index: 0, kind: input, shape index: {}]   ;;  %s922_s1 = inlined_call_operand.hbm [shape: bf16[512,128], index: 1, kind: input, shape index: {}]   ;;  %s923_s2 = inlined_call_operand.hbm [shape: f32[64,128], index: 2, kind: output, shape index: {}]  }
   0x1   :  { %8 = vsyncpa [#allocation7], 0 }
   0x2   :  { %9 = vsyncpa [#allocation5], 0  ;;  %s861_s9 = smov [#allocation3]   ;;  %s789_s13 = scalar_lea.hbm %s921_s0, 2048 }
   0x3   :  { %s15_s10 = sshll.u32 %s861_s9, 4  ;;  %p790_p0 = scmp.ne.s32.totalorder %s921_s0, %s789_s13  ;;  %s16_s10 = int_to_ptr.vmem [resolvable:$true] %s15_s10 }
   0x4   :  { %p793_p1 = scmp.lt.u32.totalorder %s789_s13, %s921_s0 }
   0x6   :  { %p795_p2 = pnand %p793_p1, %p790_p0 }
   0x8   :  { %798 = shalt.err (!%p795_p2)
}
   0x9   :  { %s799_s18 = scalar_lea.vmem %s16_s10, 2048  ;;  %p804_p4 = scmp.lt.s32.totalorder %s16_s10, %s16_s10 }
   0xa   :  { %p800_p3 = scmp.ne.s32.totalorder %s16_s10, %s799_s18  ;;  %p805_p5 = scmp.lt.s32.totalorder %s799_s18, %s799_s18 }
   0xc   :  { %p806_p6 = por %p805_p5, %p804_p4 }
   0xe   :  { %p807_p7 = pnand %p806_p6, %p800_p3 }
  0x10   :  { %810 = shalt.err (!%p807_p7)
}
  0x11   :  { %s862_s19 = smov 256   ;;  %s863_s20 = smov 16  }
  0x12   :  { %21 = dma.hbm_to_vmem [thread:$0]  %s921_s0, 2048, %s16_s10, [#allocation4], %s862_s19, %s862_s19, %s863_s20  }
  0x13   :  { %s864_s23 = smov [#allocation6]   ;;  %s811_s27 = scalar_lea.hbm %s922_s1, 4096 }
  0x14   :  { %s27_s24 = sshll.u32 %s864_s23, 4  ;;  %p812_p8 = scmp.ne.s32.totalorder %s922_s1, %s811_s27  ;;  %s28_s24 = int_to_ptr.vmem [resolvable:$true] %s27_s24 }
  0x15   :  { %p815_p9 = scmp.lt.u32.totalorder %s811_s27, %s922_s1 }
  0x17   :  { %p817_p10 = pnand %p815_p9, %p812_p8 }
  0x19   :  { %820 = shalt.err (!%p817_p10)
}
  0x1a   :  { %s821_s4 = scalar_lea.vmem %s28_s24, 4096  ;;  %p826_p12 = scmp.lt.s32.totalorder %s28_s24, %s28_s24 }
  0x1b   :  { %p822_p11 = scmp.ne.s32.totalorder %s28_s24, %s821_s4  ;;  %p827_p13 = scmp.lt.s32.totalorder %s821_s4, %s821_s4 }
  0x1d   :  { %p828_p0 = por %p827_p13, %p826_p12 }
  0x1f   :  { %p829_p1 = pnand %p828_p0, %p822_p11 }
  0x21   :  { %832 = shalt.err (!%p829_p1)
}
  0x22   :  { %s865_s0 = smov 64   ;;  %s866_s5 = smov 4  }
  0x23   :  { %33 = dma.hbm_to_vmem [thread:$0]  %s922_s1, 4096, %s28_s24, [#allocation7], %s865_s0, %s865_s0, %s866_s5  }
  0x24   :  { %855 = dma.done.wait [#allocation4], 2048  }
  0x25   :  { %856 = vsyncadd [#allocation4], 4294965248 }
  0x26   :  { %857 = dma.done.wait [#allocation7], 4096  }
  0x27   :  { %858 = vsyncadd [#allocation7], 4294963200  ;;  %v733_v0 = vld [vmem:[#allocation6 + $0x40] sm:$0xff]   ;;  %v737_v4 = vld [vmem:[#allocation6 + $0x48] sm:$0xff]   ;;  %s867_s1 = smov [#allocation8]  }
  0x28   :  { %v734_v1 = vld [vmem:[#allocation6 + $0xc0] sm:$0xff]   ;;  %644 = vmatprep.subr.bf16.mxu0 %v733_v0  ;;  %v738_v5 = vld [vmem:[#allocation6 + $0xc8] sm:$0xff]   ;;  %v741_v8 = vld [vmem:[#allocation6 + $0x50] sm:$0xff]   ;;  %s583_s8 = sshll.u32 %s867_s1, 4  ;;  %s584_s8 = int_to_ptr.vmem [resolvable:$true] %s583_s8 }
  0x29   :  { %v735_v2 = vld [vmem:[#allocation6] sm:$0xff]   ;;  %684 = vmatprep.subr.bf16.mxu1 %v734_v1  ;;  %v739_v6 = vld [vmem:[#allocation6 + $0x8] sm:$0xff]   ;;  %v742_v9 = vld [vmem:[#allocation6 + $0xd0] sm:$0xff]   ;;  %s833_s9 = scalar_lea.vmem %s584_s8, 1024  ;;  %p838_p3 = scmp.lt.s32.totalorder %s584_s8, %s584_s8 }
  0x2a   :  { %v736_v3 = vld [vmem:[#allocation6 + $0x80] sm:$0xff]   ;;  %645 = vmatpush3.bf16.msra.mxu0 %v735_v2  ;;  %v740_v7 = vld [vmem:[#allocation6 + $0x88] sm:$0xff]   ;;  %v743_v10 = vld [vmem:[#allocation6 + $0x10] sm:$0xff]   ;;  %p834_p2 = scmp.ne.s32.totalorder %s584_s8, %s833_s9  ;;  %p839_p4 = scmp.lt.s32.totalorder %s833_s9, %s833_s9 }
  0x2b   :  { %685 = vmatpush3.bf16.msra.mxu1 %v736_v3  ;;  %646 = vmatprep.subr.bf16.mxu0 %v737_v4  ;;  %v744_v11 = vld [vmem:[#allocation6 + $0x90] sm:$0xff]   ;;  %v745_v12 = vld [vmem:[#allocation6 + $0x58] sm:$0xff]   ;;  %v749_v16 = vld [vmem:[#allocation6 + $0x60] sm:$0xff]  }
  0x2c   :  { %686 = vmatprep.subr.bf16.mxu1 %v738_v5  ;;  %v746_v13 = vld [vmem:[#allocation6 + $0xd8] sm:$0xff]   ;;  %v750_v17 = vld [vmem:[#allocation6 + $0xe0] sm:$0xff]   ;;  %v753_v20 = vld [vmem:[#allocation6 + $0x68] sm:$0xff]   ;;  %p840_p5 = por %p839_p4, %p838_p3 }
  0x2d   :  { %v747_v14 = vld [vmem:[#allocation6 + $0x18] sm:$0xff]   ;;  %v751_v18 = vld [vmem:[#allocation6 + $0x20] sm:$0xff]   ;;  %v754_v21 = vld [vmem:[#allocation6 + $0xe8] sm:$0xff]  }
  0x2e   :  { %647 = vmatpush3.bf16.msra.mxu0 %v739_v6  ;;  %v748_v15 = vld [vmem:[#allocation6 + $0x98] sm:$0xff]   ;;  %v752_v19 = vld [vmem:[#allocation6 + $0xa0] sm:$0xff]   ;;  %v755_v22 = vld [vmem:[#allocation6 + $0x28] sm:$0xff]   ;;  %p841_p6 = pnand %p840_p5, %p834_p2 }
  0x2f   :  { %687 = vmatpush3.bf16.msra.mxu1 %v740_v7  ;;  %648 = vmatprep.subr.bf16.mxu0 %v741_v8  ;;  %v756_v23 = vld [vmem:[#allocation6 + $0xa8] sm:$0xff]   ;;  %v757_v24 = vld [vmem:[#allocation6 + $0x70] sm:$0xff]   ;;  %v761_v28 = vld [vmem:[#allocation6 + $0x78] sm:$0xff]  }
  0x30   :  { %688 = vmatprep.subr.bf16.mxu1 %v742_v9  ;;  %v758_v25 = vld [vmem:[#allocation6 + $0xf0] sm:$0xff]   ;;  %v762_v29 = vld [vmem:[#allocation6 + $0xf8] sm:$0xff]  }
  0x31   :  { %v759_v26 = vld [vmem:[#allocation6 + $0x30] sm:$0xff]   ;;  %v763_v30 = vld [vmem:[#allocation6 + $0x38] sm:$0xff]  }
  0x32   :  { %649 = vmatpush3.bf16.msra.mxu0 %v743_v10  ;;  %v760_v27 = vld [vmem:[#allocation6 + $0xb0] sm:$0xff]   ;;  %v764_v31 = vld [vmem:[#allocation6 + $0xb8] sm:$0xff]  }
  0x33   :  { %689 = vmatpush3.bf16.msra.mxu1 %v744_v11  ;;  %650 = vmatprep.subr.bf16.mxu0 %v745_v12  ;;  %v765_v32 = vld [vmem:[#allocation3] ss:$16 sps:$4 sm:$0xff]   ;;  %v767_v33 = vld [vmem:[#allocation3 + $0x4] ss:$16 sps:$4 sm:$0xff]   ;;  %v768_v34 = vld [vmem:[#allocation3 + $0x8] ss:$16 sps:$4 sm:$0xff]  }
  0x34   :  { %690 = vmatprep.subr.bf16.mxu1 %v746_v13  ;;  %v770_v35 = vld [vmem:[#allocation3 + $0xc] ss:$16 sps:$4 sm:$0xff]   ;;  %445 = vmatprep.mubr.bf16.mxu0 %v767_v33  ;;  %v771_v36 = vld [vmem:[#allocation3 + $0x24] ss:$16 sps:$4 sm:$0xff]   ;;  %v775_v38 = vld [vmem:[#allocation3 + $0x20] ss:$16 sps:$4 sm:$0xff]  }
  0x35   :  { %510 = vmatprep.mubr.bf16.mxu1 %v770_v35  ;;  %v773_v37 = vld [vmem:[#allocation3 + $0x2c] ss:$16 sps:$4 sm:$0xff]   ;;  %v776_v39 = vld [vmem:[#allocation3 + $0x28] ss:$16 sps:$4 sm:$0xff]   ;;  %v777_v40 = vld [vmem:[#allocation3 + $0x44] ss:$16 sps:$4 sm:$0xff]  }
  0x36   :  { %651 = vmatpush3.bf16.msra.mxu0 %v747_v14  ;;  %v779_v41 = vld [vmem:[#allocation3 + $0x4c] ss:$16 sps:$4 sm:$0xff]   ;;  %v781_v42 = vld [vmem:[#allocation3 + $0x40] ss:$16 sps:$4 sm:$0xff]   ;;  %v782_v43 = vld [vmem:[#allocation3 + $0x48] ss:$16 sps:$4 sm:$0xff]  }
  0x37   :  { %691 = vmatpush3.bf16.msra.mxu1 %v748_v15  ;;  %652 = vmatprep.subr.bf16.mxu0 %v749_v16  ;;  %v783_v44 = vld [vmem:[#allocation3 + $0x64] ss:$16 sps:$4 sm:$0xff]   ;;  %v785_v45 = vld [vmem:[#allocation3 + $0x6c] ss:$16 sps:$4 sm:$0xff]   ;;  %v787_v46 = vld [vmem:[#allocation3 + $0x60] ss:$16 sps:$4 sm:$0xff]  }
  0x38   :  { %692 = vmatprep.subr.bf16.mxu1 %v750_v17  ;;  %v788_v47 = vld [vmem:[#allocation3 + $0x68] ss:$16 sps:$4 sm:$0xff]  }
  0x3a   :  { %653 = vmatpush3.bf16.msra.mxu0 %v751_v18 }
  0x3b   :  { %693 = vmatpush3.bf16.msra.mxu1 %v752_v19  ;;  %654 = vmatprep.subr.bf16.mxu0 %v753_v20 }
  0x3c   :  { %694 = vmatprep.subr.bf16.mxu1 %v754_v21 }
  0x3e   :  { %655 = vmatpush3.bf16.msra.mxu0 %v755_v22 }
  0x3f   :  { %695 = vmatpush3.bf16.msra.mxu1 %v756_v23  ;;  %656 = vmatprep.subr.bf16.mxu0 %v757_v24 }
  0x40   :  { %696 = vmatprep.subr.bf16.mxu1 %v758_v25 }
  0x42   :  { %657 = vmatpush3.bf16.msra.mxu0 %v759_v26 }
  0x43   :  { %697 = vmatpush3.bf16.msra.mxu1 %v760_v27  ;;  %658 = vmatprep.subr.bf16.mxu0 %v761_v28 }
  0x44   :  { %698 = vmatprep.subr.bf16.mxu1 %v762_v29 }
  0x46   :  { %659 = vmatpush3.bf16.msra.mxu0 %v763_v30 }
  0x47   :  { %699 = vmatpush3.bf16.msra.mxu1 %v764_v31 }
  0x49   :  { %446 = vmatmul.mubr.bf16.vlgmr.msra.gmra.mrb[0].mxu0 %v765_v32 }
  0x4a   :  { %511 = vmatmul.mubr.bf16.vlgmr.msra.gmra.mrb[0].mxu1 %v768_v34  ;;  %453 = vmatprep.mubr.bf16.mxu0 %v771_v36 }
  0x4b   :  { %518 = vmatprep.mubr.bf16.mxu1 %v773_v37 }
  0x51   :  { %454 = vmatmul.mubr.bf16.gmra.mrb[4].mxu0 %v775_v38 }
  0x52   :  { %519 = vmatmul.mubr.bf16.gmra.mrb[4].mxu1 %v776_v39  ;;  %461 = vmatprep.mubr.bf16.mxu0 %v777_v40 }
  0x53   :  { %526 = vmatprep.mubr.bf16.mxu1 %v779_v41 }
  0x59   :  { %462 = vmatmul.mubr.bf16.gmra.mrb[8].mxu0 %v781_v42 }
  0x5a   :  { %527 = vmatmul.mubr.bf16.gmra.mrb[8].mxu1 %v782_v43  ;;  %469 = vmatprep.mubr.bf16.mxu0 %v783_v44 }
  0x5b   :  { %534 = vmatprep.mubr.bf16.mxu1 %v785_v45 }
  0x61   :  { %470 = vmatmul.mubr.bf16.gmra.mrb[12].mxu0 %v787_v46 }
  0x62   :  { %535 = vmatmul.mubr.bf16.gmra.mrb[12].mxu1 %v788_v47 }
 0x11c   :  { %v660_v48 = vpop.f32.mrb[0].mxu0 }
 0x11d   :  { %v700_v49 = vpop.f32.mrb[0].mxu1  ;;  %v661_v50 = vpop.f32.mrb[1].mxu0 }
 0x11e   :  { %v662_v51 = vadd.f32 %v661_v50, %v660_v48  ;;  %v701_v52 = vpop.f32.mrb[1].mxu1  ;;  %v663_v53 = vpop.f32.mrb[2].mxu0 }
 0x11f   :  { %v702_v54 = vadd.f32 %v701_v52, %v700_v49  ;;  %v703_v55 = vpop.f32.mrb[2].mxu1  ;;  %v664_v56 = vpop.f32.mrb[3].mxu0 }
 0x120   :  { %v665_v57 = vadd.f32 %v664_v56, %v663_v53  ;;  %v704_v58 = vpop.f32.mrb[3].mxu1 }
 0x121   :  { %v513_v59 = vadd.f32 %v702_v54, %v662_v51  ;;  %v705_v60 = vadd.f32 %v704_v58, %v703_v55 }
 0x123   :  { %570 = vst [vmem:[#allocation8] sm:$0xff] %v513_v59  ;;  %v516_v61 = vadd.f32 %v705_v60, %v665_v57 }
 0x124   :  { %v666_v62 = vpop.f32.mrb[4].mxu0 }
 0x125   :  { %571 = vst [vmem:[#allocation8 + $0x8] sm:$0xff] %v516_v61  ;;  %v706_v63 = vpop.f32.mrb[4].mxu1  ;;  %v667_v0 = vpop.f32.mrb[5].mxu0 }
 0x126   :  { %v668_v1 = vadd.f32 %v667_v0, %v666_v62  ;;  %v707_v2 = vpop.f32.mrb[5].mxu1  ;;  %v669_v3 = vpop.f32.mrb[6].mxu0 }
 0x127   :  { %v708_v4 = vadd.f32 %v707_v2, %v706_v63  ;;  %v709_v5 = vpop.f32.mrb[6].mxu1  ;;  %v670_v6 = vpop.f32.mrb[7].mxu0 }
 0x128   :  { %v671_v7 = vadd.f32 %v670_v6, %v669_v3  ;;  %v710_v8 = vpop.f32.mrb[7].mxu1 }
 0x129   :  { %v521_v9 = vadd.f32 %v708_v4, %v668_v1  ;;  %v711_v10 = vadd.f32 %v710_v8, %v709_v5 }
 0x12b   :  { %572 = vst [vmem:[#allocation8 + $0x10] sm:$0xff] %v521_v9  ;;  %v524_v11 = vadd.f32 %v711_v10, %v671_v7 }
 0x12c   :  { %v672_v12 = vpop.f32.mrb[8].mxu0 }
 0x12d   :  { %573 = vst [vmem:[#allocation8 + $0x18] sm:$0xff] %v524_v11  ;;  %v712_v13 = vpop.f32.mrb[8].mxu1  ;;  %v673_v14 = vpop.f32.mrb[9].mxu0 }
 0x12e   :  { %v674_v15 = vadd.f32 %v673_v14, %v672_v12  ;;  %v713_v16 = vpop.f32.mrb[9].mxu1  ;;  %v675_v17 = vpop.f32.mrb[10].mxu0 }
 0x12f   :  { %v714_v18 = vadd.f32 %v713_v16, %v712_v13  ;;  %v715_v19 = vpop.f32.mrb[10].mxu1  ;;  %v676_v20 = vpop.f32.mrb[11].mxu0 }
 0x130   :  { %v677_v21 = vadd.f32 %v676_v20, %v675_v17  ;;  %v716_v22 = vpop.f32.mrb[11].mxu1 }
 0x131   :  { %v529_v23 = vadd.f32 %v714_v18, %v674_v15  ;;  %v717_v24 = vadd.f32 %v716_v22, %v715_v19 }
 0x133   :  { %574 = vst [vmem:[#allocation8 + $0x20] sm:$0xff] %v529_v23  ;;  %v532_v25 = vadd.f32 %v717_v24, %v677_v21 }
 0x134   :  { %v678_v26 = vpop.f32.mrb[12].mxu0 }
 0x135   :  { %575 = vst [vmem:[#allocation8 + $0x28] sm:$0xff] %v532_v25  ;;  %v718_v27 = vpop.f32.mrb[12].mxu1  ;;  %v679_v28 = vpop.f32.mrb[13].mxu0 }
 0x136   :  { %v680_v29 = vadd.f32 %v679_v28, %v678_v26  ;;  %v719_v30 = vpop.f32.mrb[13].mxu1  ;;  %v681_v31 = vpop.f32.mrb[14].mxu0 }
 0x137   :  { %v720_v32 = vadd.f32 %v719_v30, %v718_v27  ;;  %v721_v33 = vpop.f32.mrb[14].mxu1  ;;  %v682_v34 = vpop.f32.mrb[15].mxu0 }
 0x138   :  { %v683_v35 = vadd.f32 %v682_v34, %v681_v31  ;;  %v722_v36 = vpop.f32.mrb[15].mxu1 }
 0x139   :  { %v537_v37 = vadd.f32 %v720_v32, %v680_v29  ;;  %v723_v38 = vadd.f32 %v722_v36, %v721_v33 }
 0x13b   :  { %576 = vst [vmem:[#allocation8 + $0x30] sm:$0xff] %v537_v37  ;;  %v540_v39 = vadd.f32 %v723_v38, %v683_v35 }
 0x13d   :  { %577 = vst [vmem:[#allocation8 + $0x38] sm:$0xff] %v540_v39 }
 0x13e   :  { %844 = shalt.err (!%p841_p6)
}
 0x13f   :  { %s845_s12 = scalar_lea.hbm %s923_s2, 1024 }
 0x140   :  { %p846_p7 = scmp.ne.s32.totalorder %s923_s2, %s845_s12  ;;  %p849_p8 = scmp.lt.u32.totalorder %s845_s12, %s923_s2 }
 0x142   :  { %p851_p9 = pnand %p849_p8, %p846_p7 }
 0x144   :  { %854 = shalt.err (!%p851_p9)
}
 0x145   :  { %s868_s17 = smov 128   ;;  %s869_s18 = smov 8  }
 0x146   :  { %589 = dma.vmem_to_hbm [thread:$0]  %s584_s8, 1024, %s923_s2, [#allocation5], %s868_s17, %s868_s17, %s869_s18  }
 0x147   :  { %859 = dma.done.wait [#allocation5], 1024  }
 0x148   :  { %860 = vsyncadd [#allocation5], 4294966272 }
 0x149   :  { %593 = vsyncpa [#allocation4], 1 }
 0x14a   :  { %594 = vsyncpa [#allocation7], 1 }
 0x14b   :  { %595 = vsyncpa [#allocation5], 1 }

</bundles_post_ra>
